<compile_context>
chip_gen: v6e
topology: v6e:2x2x1
jax: 0.10.0
libtpu: 0.0.40
codegen_flags: <defaults>
</compile_context>

<pallas_src>
import functools

import jax
import jax.numpy as jnp
from jax import lax
from jax.experimental import pallas as pl
from jax.experimental.pallas import tpu as pltpu


def channel_attention_kernel(x_ref, w1_ref, b1_ref, w2_ref, b2_ref, o_ref, *, inv_t):
    # x_ref / o_ref: (g, C, Tp) block in the native dtype.
    # w1_ref: (H, C) f32, b1_ref: (H, 1) f32, w2_ref: (C, H) f32, b2_ref: (C, 1) f32.
    x = x_ref[...]                                  # single load, native dtype
    g = x_ref.shape[0]

    # Mean over (possibly zero-padded) time, accumulated in f32.  inv_t uses the
    # true T, so wrapper padding does not change the mean.
    pooled = jnp.sum(x, axis=-1, keepdims=True, dtype=jnp.float32) * inv_t   # (g, C, 1)

    # Tiny MLP with the original small weights, as batched matvecs.  The weight
    # broadcast only adds a leading (replicated) dim; all tensors keep a
    # trailing singleton lane dim, so no lane<->sublane relayout is needed.
    w1b = jnp.broadcast_to(w1_ref[...], (g,) + w1_ref.shape)                 # (g, H, C)
    h = lax.dot_general(w1b, pooled, (((2,), (1,)), ((0,), (0,))),
                        preferred_element_type=jnp.float32)                  # (g, H, 1)
    h = jnp.maximum(h + b1_ref[...], 0.0)

    w2b = jnp.broadcast_to(w2_ref[...], (g,) + w2_ref.shape)                 # (g, C, H)
    logits = lax.dot_general(w2b, h, (((2,), (1,)), ((0,), (0,))),
                             preferred_element_type=jnp.float32)             # (g, C, 1)
    gate = jax.nn.sigmoid(logits + b2_ref[...])                              # (g, C, 1)

    # Gate each channel row, broadcast along the lane (time) axis, native dtype.
    o_ref[...] = x * gate.astype(o_ref.dtype)


def _vmem_capacity_bytes():
    """Per-core VMEM capacity (v5e/v6e: 128 MiB, v7x: 64 MiB); conservative fallback."""
    try:
        return int(getattr(pltpu.get_tpu_info(), "vmem_capacity_bytes", 64 << 20))
    except Exception:
        return 64 << 20


def _pick_batches_per_block(B, C, Tp, itemsize, budget_bytes):
    """Pick batches-per-block g.

    Preference order: (1) >= 4 grid steps (>= 2 per TensorCore on v7x, and room
    for intra-core pipelining), (2) an even step count so two TCs split evenly,
    (3) no ragged tail block, (4) the largest block that fits the VMEM budget.
    The VMEM estimate is dtype-aware about sublane packing (8/16/32 rows per
    tile for 4/2/1-byte dtypes).
    """
    sub_tile = (8 * 4) // itemsize
    c_pad = pl.cdiv(C, sub_tile) * sub_tile
    lane_pad = pl.cdiv(Tp, 128) * 128

    def step_bytes(g):
        # x block + out block, each double-buffered by the pipeline.
        return 4 * g * c_pad * lane_pad * itemsize

    best = None
    for g in range(1, B + 1):
        if step_bytes(g) > budget_bytes:
            continue
        steps = pl.cdiv(B, g)
        score = (
            steps >= 4,
            steps == 1 or steps % 2 == 0,
            steps * g == B,
            g,
        )
        if best is None or score > best[0]:
            best = (score, g)

    if best is None:
        # Even a single batch's (C, T) slab exceeds the budget (huge T).
        # TODO(synk): add a T grid axis ("arbitrary") with a two-pass
        # reduce-then-gate (accumulate pooled in VMEM scratch, gate on the
        # second sweep) for slabs that cannot fit v7x's 64 MiB VMEM; for now
        # fall back to g=1 and rely on the scoped-VMEM headroom.
        return 1
    return best[1]


def channel_attention(x, w1, b1, w2, b2, *, vmem_budget_bytes=None):
    """x: (B, C, T); w1: (H, C), b1: (H,), w2: (C, H), b2: (C,)
    (PyTorch nn.Linear layout: weight is (out_features, in_features))."""
    B, C, T = x.shape
    H = w1.shape[0]
    itemsize = jnp.dtype(x.dtype).itemsize

    vmem_cap = _vmem_capacity_bytes()
    if vmem_budget_bytes is None:
        vmem_budget_bytes = vmem_cap // 2

    # Lane-dense stores: pad short time axes up to one full 128-lane tile.
    # Zero padding does not change the sum, and 1/T uses the true T.
    Tp = 128 if T < 128 else T
    x_in = jnp.pad(x, ((0, 0), (0, 0), (0, Tp - T))) if Tp != T else x

    g = _pick_batches_per_block(B, C, Tp, itemsize, vmem_budget_bytes)
    grid = (pl.cdiv(B, g),)

    # Original small MLP parameters, f32, column-vector biases.
    w1f = jnp.asarray(w1, jnp.float32)              # (H, C)
    w2f = jnp.asarray(w2, jnp.float32)              # (C, H)
    b1f = jnp.asarray(b1, jnp.float32).reshape(H, 1)
    b2f = jnp.asarray(b2, jnp.float32).reshape(C, 1)

    sub_tile = (8 * 4) // itemsize
    c_pad = pl.cdiv(C, sub_tile) * sub_tile
    lane_pad = pl.cdiv(Tp, 128) * 128
    data_bytes = 4 * g * c_pad * lane_pad * itemsize                 # x + out, 2x buffered
    param_bytes = 4 * 2 * (w1f.size + w2f.size + b1f.size + b2f.size)  # 2x buffered, tiny
    vmem_limit = int(min(max(data_bytes + param_bytes + (4 << 20), 32 << 20),
                         int(0.85 * vmem_cap)))

    cost = pl.CostEstimate(
        flops=int(2 * B * C * T + 4 * B * C * H),
        transcendentals=int(B * C),
        bytes_accessed=int(2 * B * C * Tp * itemsize + param_bytes // 2),
    )

    kernel = functools.partial(channel_attention_kernel, inv_t=1.0 / float(T))

    out = pl.pallas_call(
        kernel,
        out_shape=jax.ShapeDtypeStruct((B, C, Tp), x.dtype),
        grid_spec=pltpu.PrefetchScalarGridSpec(
            num_scalar_prefetch=0,
            grid=grid,
            in_specs=[
                pl.BlockSpec((g, C, Tp), lambda i: (i, 0, 0)),   # x block for this step
                pl.BlockSpec((H, C), lambda i: (0, 0)),          # resident small params
                pl.BlockSpec((H, 1), lambda i: (0, 0)),
                pl.BlockSpec((C, H), lambda i: (0, 0)),
                pl.BlockSpec((C, 1), lambda i: (0, 0)),
            ],
            out_specs=pl.BlockSpec((g, C, Tp), lambda i: (i, 0, 0)),
        ),
        compiler_params=pltpu.CompilerParams(
            dimension_semantics=("parallel",),
            vmem_limit_bytes=vmem_limit,
        ),
        cost_estimate=cost,
    )(x_in, w1f, b1f, w2f, b2f)

    return out if Tp == T else out[..., :T]


def channel_attention_ref(x, w1, b1, w2, b2):
    """Pure-JAX reference mirroring the PyTorch forward (f32 math)."""
    pooled = jnp.mean(x, axis=-1)
    h = jax.nn.relu(pooled @ w1.T + b1)
    w = jax.nn.sigmoid(h @ w2.T + b2)
    return x * w[:, :, None]


if __name__ == "__main__":
    key = jax.random.PRNGKey(0)

    def make_case(k, B, C, T, dtype):
        H = C // 2
        kx, k1, k2, k3, k4 = jax.random.split(k, 5)
        x = jax.random.normal(kx, (B, C, T), dtype=jnp.float32).astype(dtype)
        w1 = jax.random.normal(k1, (H, C), dtype=jnp.float32) * 0.5
        b1 = jax.random.normal(k2, (H,), dtype=jnp.float32) * 0.1
        w2 = jax.random.normal(k3, (C, H), dtype=jnp.float32) * 0.5
        b2 = jax.random.normal(k4, (C,), dtype=jnp.float32) * 0.1
        return x, w1, b1, w2, b2

    cases = [
        ((2, 4, 16), jnp.float32, 1e-5, 1e-5),    # short T -> lane-padded store path
        ((4, 8, 256), jnp.float32, 1e-5, 1e-5),   # multi-step (pipelined) grid
        ((8, 4, 128), jnp.bfloat16, 3e-2, 3e-2),  # native-dtype gate path
    ]
    keys = jax.random.split(key, len(cases))
    for (shape, dtype, atol, rtol), k in zip(cases, keys):
        B, C, T = shape
        x, w1, b1, w2, b2 = make_case(k, B, C, T, dtype)
        out = jax.block_until_ready(channel_attention(x, w1, b1, w2, b2))
        assert out.shape == x.shape and out.dtype == x.dtype
        ref = channel_attention_ref(x.astype(jnp.float32), w1, b1, w2, b2)
        assert jnp.allclose(out.astype(jnp.float32), ref, atol=atol, rtol=rtol), (
            f"mismatch vs reference for shape={shape}, dtype={dtype}")

    print("KERNEL_OK")
</pallas_src>

<mosaic_0001>
module attributes {stable_mosaic.version = 11 : i64} {
  func.func @channel_attention_kernel(%arg0: i32, %arg1: memref<2x4x128xf32, #tpu.memory_space<vmem>>, %arg2: memref<2x4xf32, #tpu.memory_space<vmem>>, %arg3: memref<2x1xf32, #tpu.memory_space<vmem>>, %arg4: memref<4x2xf32, #tpu.memory_space<vmem>>, %arg5: memref<4x1xf32, #tpu.memory_space<vmem>>, %arg6: memref<2x4x128xf32, #tpu.memory_space<vmem>>) attributes {dimension_semantics = [#tpu.dimension_semantics<parallel>], iteration_bounds = array<i64: 1>, scalar_prefetch = 0 : i64, scratch_operands = 0 : i64, tpu.core_type = #tpu.core_type<tc>, window_params = [{transform_indices = @transform_0, window_bounds = array<i64: 2, 4, 128>}, {pipeline_mode = #tpu.pipeline_mode<synchronous>, transform_indices = @transform_1, window_bounds = array<i64: 2, 4>}, {pipeline_mode = #tpu.pipeline_mode<synchronous>, transform_indices = @transform_2, window_bounds = array<i64: 2, 1>}, {pipeline_mode = #tpu.pipeline_mode<synchronous>, transform_indices = @transform_3, window_bounds = array<i64: 4, 2>}, {pipeline_mode = #tpu.pipeline_mode<synchronous>, transform_indices = @transform_4, window_bounds = array<i64: 4, 1>}, {transform_indices = @transform_5, window_bounds = array<i64: 2, 4, 128>}]} {
    %c0 = arith.constant 0 : index
    %c0_0 = arith.constant 0 : index
    %c0_1 = arith.constant 0 : index
    %0 = vector.load %arg1[%c0, %c0_0, %c0_1] : memref<2x4x128xf32, #tpu.memory_space<vmem>>, vector<2x4x128xf32>
    %cst = arith.constant dense<0.000000e+00> : vector<2x4xf32>
    %1 = vector.multi_reduction <add>, %0, %cst [2] : vector<2x4x128xf32> to vector<2x4xf32>
    %2 = vector.shape_cast %1 : vector<2x4xf32> to vector<2x4x1xf32>
    %cst_2 = arith.constant 6.250000e-02 : f32
    %3 = vector.broadcast %cst_2 : f32 to vector<2x4x1xf32>
    %4 = arith.mulf %2, %3 : vector<2x4x1xf32>
    %c0_3 = arith.constant 0 : index
    %c0_4 = arith.constant 0 : index
    %5 = vector.load %arg2[%c0_3, %c0_4] : memref<2x4xf32, #tpu.memory_space<vmem>>, vector<2x4xf32>
    %6 = vector.shape_cast %5 : vector<2x4xf32> to vector<1x2x4xf32>
    %7 = vector.broadcast %6 : vector<1x2x4xf32> to vector<2x2x4xf32>
    %cst_5 = arith.constant dense<0.000000e+00> : vector<2x2x1xf32>
    %8 = tpu.matmul %7, %4, %cst_5 {dimension_numbers = #tpu.dot_dimension_numbers<[2], [1], [1], [2], [0, 0, 0, 1, 1, 2], [0], [0]>} : vector<2x2x4xf32>, vector<2x4x1xf32>, vector<2x2x1xf32> -> vector<2x2x1xf32>
    %c0_6 = arith.constant 0 : index
    %c0_7 = arith.constant 0 : index
    %9 = vector.load %arg3[%c0_6, %c0_7] : memref<2x1xf32, #tpu.memory_space<vmem>>, vector<2x1xf32>
    %10 = vector.shape_cast %9 : vector<2x1xf32> to vector<1x2x1xf32>
    %11 = vector.broadcast %10 : vector<1x2x1xf32> to vector<2x2x1xf32>
    %12 = arith.addf %8, %11 : vector<2x2x1xf32>
    %cst_8 = arith.constant 0.000000e+00 : f32
    %13 = vector.broadcast %cst_8 : f32 to vector<2x2x1xf32>
    %14 = arith.maximumf %12, %13 : vector<2x2x1xf32>
    %c0_9 = arith.constant 0 : index
    %c0_10 = arith.constant 0 : index
    %15 = vector.load %arg4[%c0_9, %c0_10] : memref<4x2xf32, #tpu.memory_space<vmem>>, vector<4x2xf32>
    %16 = vector.shape_cast %15 : vector<4x2xf32> to vector<1x4x2xf32>
    %17 = vector.broadcast %16 : vector<1x4x2xf32> to vector<2x4x2xf32>
    %cst_11 = arith.constant dense<0.000000e+00> : vector<2x4x1xf32>
    %18 = tpu.matmul %17, %14, %cst_11 {dimension_numbers = #tpu.dot_dimension_numbers<[2], [1], [1], [2], [0, 0, 0, 1, 1, 2], [0], [0]>} : vector<2x4x2xf32>, vector<2x2x1xf32>, vector<2x4x1xf32> -> vector<2x4x1xf32>
    %c0_12 = arith.constant 0 : index
    %c0_13 = arith.constant 0 : index
    %19 = vector.load %arg5[%c0_12, %c0_13] : memref<4x1xf32, #tpu.memory_space<vmem>>, vector<4x1xf32>
    %20 = vector.shape_cast %19 : vector<4x1xf32> to vector<1x4x1xf32>
    %21 = vector.broadcast %20 : vector<1x4x1xf32> to vector<2x4x1xf32>
    %22 = arith.addf %18, %21 : vector<2x4x1xf32>
    %23 = arith.negf %22 : vector<2x4x1xf32>
    %24 = math.exp %23 : vector<2x4x1xf32>
    %cst_14 = arith.constant 1.000000e+00 : f32
    %25 = vector.broadcast %cst_14 : f32 to vector<2x4x1xf32>
    %26 = arith.addf %25, %24 : vector<2x4x1xf32>
    %27 = arith.divf %25, %26 : vector<2x4x1xf32>
    %28 = vector.broadcast %27 : vector<2x4x1xf32> to vector<2x4x128xf32>
    %29 = arith.mulf %0, %28 : vector<2x4x128xf32>
    %c0_15 = arith.constant 0 : index
    %c0_16 = arith.constant 0 : index
    %c0_17 = arith.constant 0 : index
    %30 = vector.load %arg6[%c0_15, %c0_16, %c0_17] : memref<2x4x128xf32, #tpu.memory_space<vmem>>, vector<2x4x128xf32>
    tpu.vector_store %arg6[%c0_15, %c0_16, %c0_17], %29 {strides = array<i32>} : memref<2x4x128xf32, #tpu.memory_space<vmem>>, vector<2x4x128xf32>,
    return
  }
  func.func @transform_0(%arg0: i32) -> (i32, i32, i32) {
    %c0_i32 = arith.constant 0 : i32
    %c0_i32_0 = arith.constant 0 : i32
    %c0_i32_1 = arith.constant 0 : i32
    return %arg0, %c0_i32, %c0_i32_0 : i32, i32, i32
  }
  func.func @transform_1(%arg0: i32) -> (i32, i32) {
    %c0_i32 = arith.constant 0 : i32
    %c0_i32_0 = arith.constant 0 : i32
    %c0_i32_1 = arith.constant 0 : i32
    return %c0_i32, %c0_i32_0 : i32, i32
  }
  func.func @transform_2(%arg0: i32) -> (i32, i32) {
    %c0_i32 = arith.constant 0 : i32
    %c0_i32_0 = arith.constant 0 : i32
    %c0_i32_1 = arith.constant 0 : i32
    return %c0_i32, %c0_i32_0 : i32, i32
  }
  func.func @transform_3(%arg0: i32) -> (i32, i32) {
    %c0_i32 = arith.constant 0 : i32
    %c0_i32_0 = arith.constant 0 : i32
    %c0_i32_1 = arith.constant 0 : i32
    return %c0_i32, %c0_i32_0 : i32, i32
  }
  func.func @transform_4(%arg0: i32) -> (i32, i32) {
    %c0_i32 = arith.constant 0 : i32
    %c0_i32_0 = arith.constant 0 : i32
    %c0_i32_1 = arith.constant 0 : i32
    return %c0_i32, %c0_i32_0 : i32, i32
  }
  func.func @transform_5(%arg0: i32) -> (i32, i32, i32) {
    %c0_i32 = arith.constant 0 : i32
    %c0_i32_0 = arith.constant 0 : i32
    %c0_i32_1 = arith.constant 0 : i32
    return %arg0, %c0_i32, %c0_i32_0 : i32, i32, i32
  }
}

</mosaic_0001>

<bundles_post_ra>
// kernel: tpu_custom_call.1
= control target key start
LH: loop header
LB: loop body
LE: loop exit
PB: predicated region body
PF: predicated region fallthrough
CT: control target
= control target key end

     0   :  { %vm23_vm0 = vcmask 1043456   ;;  %s530_s0 = inlined_call_operand.vmem [shape: f32[2,4,128], index: 0, kind: input, shape index: {}]   ;;  %s531_s1 = inlined_call_operand.vmem [shape: f32[2,4], index: 1, kind: input, shape index: {}]   ;;  %s532_s2 = inlined_call_operand.vmem [shape: f32[2,1], index: 2, kind: input, shape index: {}]   ;;  %s533_s3 = inlined_call_operand.vmem [shape: f32[4,2], index: 3, kind: input, shape index: {}]   ;;  %s534_s4 = inlined_call_operand.vmem [shape: f32[4,1], index: 4, kind: input, shape index: {}]   ;;  %s535_s5 = inlined_call_operand.hbm [shape: f32[2,4,128], index: 5, kind: output, shape index: {}]  }
   0x1   :  { %v496_v0 = vld [vmem:[%s530_s0] sm:$0xf]  ;;  %v501_v1 = vld [vmem:[%s530_s0 + $0x4] sm:$0xf] }
   0x2   :  { %v24_v2 = vsel %vm23_vm0, %v496_v0, 0.0 }
   0x3   :  { %10 = vsyncpa [#allocation3], 0  ;;  %25 = vadd.xlane.f32.xlu0 %v24_v2  ;;  %v27_v3 = vsel %vm23_vm0, %v501_v1, 0.0  ;;  %v457_v4 = vmov 0.0   ;;  %vm458_vm1 = vmmov 0   ;;  %vm34_vm2 = vcmask 31744  }
   0x4   :  { %399 = vmatprep.subr.mxu0 %v457_v4  ;;  %404 = vmatprep.subr.mxu1 %v457_v4  ;;  %v32_v7 = vld [vmem:[%s531_s1] sm:$0x3]  ;;  %vm192_vm3 = vcmask 1041408   ;;  %vm188_vm4 = vcmask 15360   ;;  %v459_v20 = vmov 0  }
   0x5   :  { %401 = vmatprep.mubr.msk.f32.mxu0 %vm458_vm1, %v457_v4  ;;  %406 = vmatprep.mubr.msk.f32.mxu1 %vm458_vm1, %v457_v4  ;;  %v33_v10 = vld [vmem:[%s532_s2] sm:$0x3] }
   0x6   :  { %v186_v15 = vld [vmem:[%s533_s3] sm:$0xf]  ;;  %425 = vset.pattern.permute.xlu1 %v459_v20  ;;  %426 = vset.pattern.permute.xlu0 %v459_v20  ;;  %s460_s3 = smov [#allocation2]  }
   0x7   :  { %28 = vadd.xlane.f32.xlu0 %v27_v3  ;;  %v187_v21 = vld [vmem:[%s534_s4] sm:$0xf]  ;;  %s370_s4 = sshll.u32 %s460_s3, 4  ;;  %s371_s4 = int_to_ptr.vmem [resolvable:$true] %s370_s4 }
   0x8   :  { %s435_s27 = scalar_lea.vmem %s371_s4, 128  ;;  %p440_p1 = scmp.lt.s32.totalorder %s371_s4, %s371_s4 }
   0x9   :  { %p436_p0 = scmp.ne.s32.totalorder %s371_s4, %s435_s27  ;;  %p441_p2 = scmp.lt.s32.totalorder %s435_s27, %s435_s27 }
   0xb   :  { %p442_p3 = por %p441_p2, %p440_p1 }
   0xd   :  { %p443_p4 = pnand %p442_p3, %p436_p0 }
  0x8c   :  { %v26_v5 = vpop.xlane.xlu0 %25 }
  0x8d   :  { %v30_v6 = vmul.f32 0.0625, %v26_v5 }
  0x8f   :  { %400 = vmatpush3.msk.msra.mxu0 %vm23_vm0, %v30_v6 }
  0x90   :  { %402 = vmatmul.mubr.msk.f32.vlgmr.msra.gmra.mxu0 %vm34_vm2, %v32_v7  ;;  %v29_v8 = vpop.xlane.xlu0 %28  ;;  %409 = vmatprep.subr.mxu0 %v457_v4 }
  0x91   :  { %v31_v9 = vmul.f32 0.0625, %v29_v8  ;;  %411 = vmatprep.mubr.msk.f32.mxu0 %vm458_vm1, %v457_v4 }
  0x93   :  { %405 = vmatpush3.msk.msra.mxu1 %vm23_vm0, %v31_v9 }
  0x94   :  { %407 = vmatmul.mubr.msk.f32.vlgmr.msra.gmra.mxu1 %vm34_vm2, %v32_v7  ;;  %414 = vmatprep.subr.mxu1 %v457_v4 }
  0x95   :  { %416 = vmatprep.mubr.msk.f32.mxu1 %vm458_vm1, %v457_v4 }
 0x150   :  { %v107_v11 = vpop.f32.mrf.mxu0 }
 0x151   :  { %v108_v12 = vadd.f32 %v107_v11, %v33_v10 }
 0x152   :  { %v403_v13 = vpop.f32.mrf.mxu0 }
 0x153   :  { %v184_v14 = vmax.f32 %v108_v12, 0.0 }
 0x154   :  { %v180_v16 = vpop.f32.mrf.mxu1 }
 0x155   :  { %v181_v17 = vadd.f32 %v180_v16, %v33_v10  ;;  %410 = vmatpush3.msk.msra.mxu0 %vm192_vm3, %v184_v14 }
 0x156   :  { %v408_v18 = vpop.f32.mrf.mxu1  ;;  %412 = vmatmul.mubr.msk.f32.vlgmr.msra.gmra.mxu0 %vm188_vm4, %v186_v15 }
 0x157   :  { %v185_v19 = vmax.f32 %v181_v17, 0.0 }
 0x159   :  { %415 = vmatpush3.msk.msra.mxu1 %vm192_vm3, %v185_v19 }
 0x15a   :  { %417 = vmatmul.mubr.msk.f32.vlgmr.msra.gmra.mxu1 %vm188_vm4, %v186_v15 }
 0x216   :  { %v262_v22 = vpop.f32.mrf.mxu0 }
 0x217   :  { %v263_v23 = vadd.f32 %v262_v22, %v187_v21 }
 0x218   :  { %v413_v24 = vpop.f32.mrf.mxu0 }
 0x219   :  { %v389_v25 = vmul.f32 -1.442695, %v263_v23 }
 0x21a   :  { %v335_v26 = vpop.f32.mrf.mxu1 }
 0x21b   :  { %427 = vpow2.f32 %v389_v25  ;;  %v336_v27 = vadd.f32 %v335_v26, %v187_v21 }
 0x21c   :  { %v418_v28 = vpop.f32.mrf.mxu1 }
 0x21d   :  { %v390_v29 = vmul.f32 -1.442695, %v336_v27 }
 0x21f   :  { %429 = vpow2.f32 %v390_v29 }
 0x228   :  { %v428_v30 = vpop.eup %427 }
 0x229   :  { %v345_v31 = vadd.f32 1.0, %v428_v30 }
 0x22b   :  { %431 = vrcp.f32 %v345_v31 }
 0x22c   :  { %v430_v32 = vpop.eup %429 }
 0x22d   :  { %v346_v33 = vadd.f32 1.0, %v430_v32 }
 0x22f   :  { %433 = vrcp.f32 %v346_v33 }
 0x238   :  { %v432_v34 = vpop.eup %431 }
 0x239   :  { %353 = vperm.xlu1 %425, %v432_v34  }
 0x23c   :  { %v434_v35 = vpop.eup %433 }
 0x23d   :  { %358 = vperm.xlu1 %425, %v434_v35  }
 0x2b4   :  { %v354_v36 = vpop.permute.xlu1 %353 }
 0x2b5   :  { %v361_v37 = vmul.f32 %v354_v36, %v496_v0 }
 0x2b7   :  { %363 = vst [vmem:[#allocation2] sm:$0xf] %v361_v37 }
 0x2b8   :  { %v359_v38 = vpop.permute.xlu1 %358 }
 0x2b9   :  { %v362_v39 = vmul.f32 %v359_v38, %v501_v1 }
 0x2bb   :  { %364 = vst [vmem:[#allocation2 + $0x4] sm:$0xf] %v362_v39 }
 0x2bc   :  { %446 = shalt.err (!%p443_p4)
}
 0x2bd   :  { %s461_s28 = smov 64   ;;  %s462_s29 = smov 4  }
 0x2be   :  { %376 = dma.vmem_to_hbm [thread:$0]  %s371_s4, 128, %s535_s5, [#allocation3], %s461_s28, %s461_s28, %s462_s29  }
 0x2bf   :  { %455 = dma.done.wait [#allocation3], 128  }
 0x2c0   :  { %456 = vsyncadd [#allocation3], 4294967168 }
 0x2c1   :  { %380 = vsyncpa [#allocation3], 1 }

</bundles_post_ra>
